<compile_context>
chip_gen: v7x
topology: tpu7x:2x2x1
jax: 0.10.0
libtpu: 0.0.40
codegen_flags: <defaults>
</compile_context>

<pallas_src>
import functools

import jax
import jax.numpy as jnp
import numpy as np
from jax.experimental import pallas as pl
from jax.experimental.pallas import tpu as pltpu

_EPS = 1e-5


# ----------------------------------------------------------------------------
# Shared helper: im2col of a 3x3 / stride-1 / pad-1 conv on a flattened image.
# ----------------------------------------------------------------------------
def _im2col_shift(x, W):
    """x: (C, H*W).  Returns (9*C, H*W); row order (ky, kx, c).

    Conv tap (dy, dx) on the flattened spatial axis is a lane shift by
    dy*W + dx (zero-filled at the ends) combined with a column mask for
    dx != 0 that removes the terms that would wrap across image rows.
    Only lane-axis slices/concats and VPU multiplies; no padding buffer,
    no (H, W) window copies, no reshapes.
    """
    C, HW = x.shape
    col = jax.lax.broadcasted_iota(jnp.int32, (1, HW), 1) % W
    m_left = (col >= 1).astype(x.dtype)        # tap reads x-1: column 0 invalid
    m_right = (col <= W - 2).astype(x.dtype)   # tap reads x+1: column W-1 invalid
    slabs = []
    for dy in (-1, 0, 1):
        for dx in (-1, 0, 1):
            s = dy * W + dx
            if s > 0:
                shifted = jnp.concatenate(
                    [x[:, s:], jnp.zeros((C, s), x.dtype)], axis=1)
            elif s < 0:
                shifted = jnp.concatenate(
                    [jnp.zeros((C, -s), x.dtype), x[:, :HW + s]], axis=1)
            else:
                shifted = x
            if dx == -1:
                shifted = shifted * m_left
            elif dx == 1:
                shifted = shifted * m_right
            slabs.append(shifted)
    return jnp.concatenate(slabs, axis=0)      # (9*C, HW)


def _stats(y):
    """Per-channel [sum, sum-of-squares] of a (C, HW) tile -> (C, 2)."""
    return jnp.concatenate([jnp.sum(y, axis=1, keepdims=True),
                            jnp.sum(y * y, axis=1, keepdims=True)], axis=1)


# ----------------------------------------------------------------------------
# Kernel A: conv1 (+ optional shortcut conv) + bias + BN batch-stat epilogue.
# ----------------------------------------------------------------------------
def _front_kernel(x_ref, w1_ref, b1_ref, y1_ref, s1_ref, *, W):
    k = _im2col_shift(x_ref[0], W)                               # (9Cin, HW)
    y1 = jnp.dot(w1_ref[...], k,
                 preferred_element_type=jnp.float32) + b1_ref[...]
    y1_ref[0] = y1
    s1_ref[0] = _stats(y1)


def _front_kernel_ds(x_ref, w1_ref, b1_ref, wd_ref, bd_ref,
                     y1_ref, s1_ref, yd_ref, sd_ref, *, W):
    k = _im2col_shift(x_ref[0], W)      # one im2col shared by both convs
    y1 = jnp.dot(w1_ref[...], k,
                 preferred_element_type=jnp.float32) + b1_ref[...]
    y1_ref[0] = y1
    s1_ref[0] = _stats(y1)
    yd = jnp.dot(wd_ref[...], k,
                 preferred_element_type=jnp.float32) + bd_ref[...]
    yd_ref[0] = yd
    sd_ref[0] = _stats(yd)


# ----------------------------------------------------------------------------
# Kernel B: BN-apply + ReLU + conv2 + bias + residual add + final ReLU.
# ----------------------------------------------------------------------------
def _back_kernel(y1_ref, a1_ref, c1_ref, w2_ref, b2_ref, sc_ref, o_ref, *, W):
    h = jnp.maximum(y1_ref[0] * a1_ref[...] + c1_ref[...], 0.0)  # BN + ReLU
    k = _im2col_shift(h, W)
    out = jnp.dot(w2_ref[...], k,
                  preferred_element_type=jnp.float32) + b2_ref[...]
    o_ref[0] = jnp.maximum(out + sc_ref[0], 0.0)                 # identity shortcut


def _back_kernel_ds(y1_ref, a1_ref, c1_ref, w2_ref, b2_ref,
                    yd_ref, ad_ref, cd_ref, o_ref, *, W):
    h = jnp.maximum(y1_ref[0] * a1_ref[...] + c1_ref[...], 0.0)
    k = _im2col_shift(h, W)
    out = jnp.dot(w2_ref[...], k,
                  preferred_element_type=jnp.float32) + b2_ref[...]
    sc = yd_ref[0] * ad_ref[...] + cd_ref[...]                   # BN on shortcut conv
    o_ref[0] = jnp.maximum(out + sc, 0.0)


# ----------------------------------------------------------------------------
# Wrapper glue.
# ----------------------------------------------------------------------------
def _img_spec(C, HW):
    return pl.BlockSpec((1, C, HW), lambda n: (n, 0, 0))


def _full_spec(shape):
    nd = len(shape)
    return pl.BlockSpec(tuple(shape), lambda n, _nd=nd: (0,) * _nd)


def _wmat(w_hwio):
    # (3, 3, Cin, Cout) HWIO -> (Cout, 9*Cin); column order (ky, kx, ci) matches
    # the row order produced by _im2col_shift.
    kh, kw, cin, cout = w_hwio.shape
    return jnp.transpose(w_hwio, (3, 0, 1, 2)).reshape(cout, kh * kw * cin)


def _bn_affine(stats, gamma, beta, count):
    # stats: (N, C, 2) per-image [sum, sumsq].  Fold training-mode BatchNorm
    # (biased variance, eps inside rsqrt) into a per-channel affine y*a + c.
    tot = jnp.sum(stats, axis=0)                       # (C, 2)
    mean = tot[:, 0:1] / count
    var = jnp.maximum(tot[:, 1:2] / count - mean * mean, 0.0)
    scale = gamma.reshape(-1, 1) * jax.lax.rsqrt(var + _EPS)
    shift = beta.reshape(-1, 1) - mean * scale
    return scale, shift                                # each (C, 1)


@functools.partial(jax.jit, static_argnames=("downsample",))
def residual_block_forward(x_nchw, params, downsample=False):
    N, Cin, H, W = x_nchw.shape
    HW = H * W
    Cout = params["w1"].shape[-1]
    f32 = jnp.float32

    xf = x_nchw.reshape(N, Cin, HW)     # free: NCHW is already (C, H*W)-contiguous

    w1 = _wmat(params["w1"]); b1 = params["b1"].reshape(Cout, 1)
    w2 = _wmat(params["w2"]); b2 = params["b2"].reshape(Cout, 1)

    cparams = pltpu.CompilerParams(
        dimension_semantics=("parallel",),
        vmem_limit_bytes=32 * 1024 * 1024)

    img_in = _img_spec(Cin, HW)
    img_out = _img_spec(Cout, HW)
    st_out = pl.BlockSpec((1, Cout, 2), lambda n: (n, 0, 0))

    if downsample:
        wd = _wmat(params["wd"]); bd = params["bd"].reshape(Cout, 1)
        y1, st1, yd, std = pl.pallas_call(
            functools.partial(_front_kernel_ds, W=W),
            grid=(N,),
            in_specs=[img_in, _full_spec(w1.shape), _full_spec(b1.shape),
                      _full_spec(wd.shape), _full_spec(bd.shape)],
            out_specs=(img_out, st_out, img_out, st_out),
            out_shape=(jax.ShapeDtypeStruct((N, Cout, HW), f32),
                       jax.ShapeDtypeStruct((N, Cout, 2), f32),
                       jax.ShapeDtypeStruct((N, Cout, HW), f32),
                       jax.ShapeDtypeStruct((N, Cout, 2), f32)),
            compiler_params=cparams,
        )(xf, w1, b1, wd, bd)
    else:
        y1, st1 = pl.pallas_call(
            functools.partial(_front_kernel, W=W),
            grid=(N,),
            in_specs=[img_in, _full_spec(w1.shape), _full_spec(b1.shape)],
            out_specs=(img_out, st_out),
            out_shape=(jax.ShapeDtypeStruct((N, Cout, HW), f32),
                       jax.ShapeDtypeStruct((N, Cout, 2), f32)),
            compiler_params=cparams,
        )(xf, w1, b1)

    # Tiny (C,)-sized glue: fold the batch statistics into per-channel affines.
    a1, c1 = _bn_affine(st1, params["g1"], params["be1"], N * HW)

    if downsample:
        ad, cd = _bn_affine(std, params["gd"], params["bed"], N * HW)
        out = pl.pallas_call(
            functools.partial(_back_kernel_ds, W=W),
            grid=(N,),
            in_specs=[img_out, _full_spec(a1.shape), _full_spec(c1.shape),
                      _full_spec(w2.shape), _full_spec(b2.shape),
                      img_out, _full_spec(ad.shape), _full_spec(cd.shape)],
            out_specs=img_out,
            out_shape=jax.ShapeDtypeStruct((N, Cout, HW), f32),
            compiler_params=cparams,
        )(y1, a1, c1, w2, b2, yd, ad, cd)
    else:
        out = pl.pallas_call(
            functools.partial(_back_kernel, W=W),
            grid=(N,),
            in_specs=[img_out, _full_spec(a1.shape), _full_spec(c1.shape),
                      _full_spec(w2.shape), _full_spec(b2.shape), img_in],
            out_specs=img_out,
            out_shape=jax.ShapeDtypeStruct((N, Cout, HW), f32),
            compiler_params=cparams,
        )(y1, a1, c1, w2, b2, xf)

    return out.reshape(N, Cout, H, W)   # free reshape back to NCHW


# ----------------------------------------------------------------------------
# Pure-JAX reference (correctness check of the Pallas path).
# ----------------------------------------------------------------------------
def _conv_ref(x_nchw, w_hwio, b):
    y = jax.lax.conv_general_dilated(
        x_nchw, w_hwio, window_strides=(1, 1), padding="SAME",
        dimension_numbers=("NCHW", "HWIO", "NCHW"))
    return y + b.reshape(1, -1, 1, 1)


def _bn_ref(x, g, b, relu):
    mean = x.mean(axis=(0, 2, 3), keepdims=True)
    var = ((x - mean) ** 2).mean(axis=(0, 2, 3), keepdims=True)
    y = (x - mean) / jnp.sqrt(var + _EPS) * g.reshape(1, -1, 1, 1) \
        + b.reshape(1, -1, 1, 1)
    return jnp.maximum(y, 0.0) if relu else y


def _ref_forward(x_nchw, p, downsample):
    out = _conv_ref(x_nchw, p["w1"], p["b1"])
    out = _bn_ref(out, p["g1"], p["be1"], True)
    out = _conv_ref(out, p["w2"], p["b2"])
    sc = x_nchw
    if downsample:
        sc = _bn_ref(_conv_ref(x_nchw, p["wd"], p["bd"]),
                     p["gd"], p["bed"], False)
    return jnp.maximum(out + sc, 0.0)


def init_params(key, cin, cout):
    ks = jax.random.split(key, 6)
    f32 = jnp.float32
    return {
        # conv weights stored HWIO (kh, kw, in, out)
        "w1": 0.1 * jax.random.normal(ks[0], (3, 3, cin, cout), f32),
        "b1": 0.1 * jax.random.normal(ks[1], (cout,), f32),
        "g1": jnp.ones((cout,), f32),
        "be1": jnp.zeros((cout,), f32),
        "w2": 0.1 * jax.random.normal(ks[2], (3, 3, cout, cout), f32),
        "b2": 0.1 * jax.random.normal(ks[3], (cout,), f32),
        "wd": 0.1 * jax.random.normal(ks[4], (3, 3, cin, cout), f32),
        "bd": 0.1 * jax.random.normal(ks[5], (cout,), f32),
        "gd": jnp.ones((cout,), f32),
        "bed": jnp.zeros((cout,), f32),
    }


if __name__ == "__main__":
    key = jax.random.PRNGKey(0)
    kx, kp = jax.random.split(key)

    N, C, H, W = 2, 4, 16, 16          # in_channel == out_channel (default block)
    x = jax.random.normal(kx, (N, C, H, W), jnp.float32)
    params = init_params(kp, C, C)

    # default module args: stride=1, downsample=False
    y = jax.block_until_ready(residual_block_forward(x, params, downsample=False))
    np.testing.assert_allclose(np.asarray(y),
                               np.asarray(_ref_forward(x, params, False)),
                               rtol=1e-3, atol=1e-3)

    # also exercise the downsample branch (conv + bn on the shortcut)
    y2 = jax.block_until_ready(residual_block_forward(x, params, downsample=True))
    np.testing.assert_allclose(np.asarray(y2),
                               np.asarray(_ref_forward(x, params, True)),
                               rtol=1e-3, atol=1e-3)

    print("KERNEL_OK")
</pallas_src>

<mosaic_0001>
module attributes {stable_mosaic.version = 11 : i64} {
  func.func @_back_kernel(%arg0: i32, %arg1: memref<1x4x256xf32, #tpu.memory_space<vmem>>, %arg2: memref<4x1xf32, #tpu.memory_space<vmem>>, %arg3: memref<4x1xf32, #tpu.memory_space<vmem>>, %arg4: memref<4x36xf32, #tpu.memory_space<vmem>>, %arg5: memref<4x1xf32, #tpu.memory_space<vmem>>, %arg6: memref<1x4x256xf32, #tpu.memory_space<vmem>>, %arg7: memref<1x4x256xf32, #tpu.memory_space<vmem>>) attributes {dimension_semantics = [#tpu.dimension_semantics<parallel>], iteration_bounds = array<i64: 2>, scalar_prefetch = 0 : i64, scratch_operands = 0 : i64, tpu.core_type = #tpu.core_type<tc>, window_params = [{transform_indices = @transform_0, window_bounds = array<i64: 1, 4, 256>}, {pipeline_mode = #tpu.pipeline_mode<synchronous>, transform_indices = @transform_1, window_bounds = array<i64: 4, 1>}, {pipeline_mode = #tpu.pipeline_mode<synchronous>, transform_indices = @transform_2, window_bounds = array<i64: 4, 1>}, {pipeline_mode = #tpu.pipeline_mode<synchronous>, transform_indices = @transform_3, window_bounds = array<i64: 4, 36>}, {pipeline_mode = #tpu.pipeline_mode<synchronous>, transform_indices = @transform_4, window_bounds = array<i64: 4, 1>}, {transform_indices = @transform_5, window_bounds = array<i64: 1, 4, 256>}, {transform_indices = @transform_6, window_bounds = array<i64: 1, 4, 256>}]} {
    %c0 = arith.constant 0 : index
    %c0_0 = arith.constant 0 : index
    %c0_1 = arith.constant 0 : index
    %0 = vector.load %arg1[%c0, %c0_0, %c0_1] : memref<1x4x256xf32, #tpu.memory_space<vmem>>, vector<1x4x256xf32>
    %1 = vector.shape_cast %0 : vector<1x4x256xf32> to vector<4x256xf32>
    %c0_2 = arith.constant 0 : index
    %c0_3 = arith.constant 0 : index
    %2 = vector.load %arg2[%c0_2, %c0_3] : memref<4x1xf32, #tpu.memory_space<vmem>>, vector<4x1xf32>
    %3 = vector.broadcast %2 : vector<4x1xf32> to vector<4x256xf32>
    %4 = arith.mulf %1, %3 : vector<4x256xf32>
    %c0_4 = arith.constant 0 : index
    %c0_5 = arith.constant 0 : index
    %5 = vector.load %arg3[%c0_4, %c0_5] : memref<4x1xf32, #tpu.memory_space<vmem>>, vector<4x1xf32>
    %6 = vector.broadcast %5 : vector<4x1xf32> to vector<4x256xf32>
    %7 = arith.addf %4, %6 : vector<4x256xf32>
    %cst = arith.constant 0.000000e+00 : f32
    %8 = vector.broadcast %cst : f32 to vector<4x256xf32>
    %9 = arith.maximumf %7, %8 : vector<4x256xf32>
    %10 = tpu.iota {dimensions = array<i32: 1>} : vector<1x256xi32>
    %c16_i32 = arith.constant 16 : i32
    %c0_i32 = arith.constant 0 : i32
    %11 = arith.cmpi eq, %c16_i32, %c0_i32 : i32
    %c1_i32 = arith.constant 1 : i32
    %12 = arith.select %11, %c1_i32, %c16_i32 : i32
    %13 = vector.broadcast %12 : i32 to vector<1x256xi32>
    %14 = arith.remsi %10, %13 : vector<1x256xi32>
    %c0_i32_6 = arith.constant 0 : i32
    %15 = vector.broadcast %c0_i32_6 : i32 to vector<1x256xi32>
    %16 = arith.cmpi ne, %14, %15 : vector<1x256xi32>
    %c0_i32_7 = arith.constant 0 : i32
    %17 = vector.broadcast %c0_i32_7 : i32 to vector<1x256xi32>
    %18 = arith.cmpi slt, %14, %17 : vector<1x256xi32>
    %c0_i32_8 = arith.constant 0 : i32
    %19 = arith.cmpi slt, %12, %c0_i32_8 : i32
    %20 = vector.broadcast %19 : i1 to vector<1x256xi1>
    %21 = vector.broadcast %20 : vector<1x256xi1> to vector<1x256xi1>
    %22 = arith.xori %18, %21 : vector<1x256xi1>
    %23 = arith.andi %22, %16 : vector<1x256xi1>
    %24 = vector.broadcast %12 : i32 to vector<1x256xi32>
    %25 = arith.addi %14, %24 : vector<1x256xi32>
    %26 = arith.select %23, %25, %14 : vector<1x256xi1>, vector<1x256xi32>
    %c1_i32_9 = arith.constant 1 : i32
    %27 = vector.broadcast %c1_i32_9 : i32 to vector<1x256xi32>
    %28 = arith.cmpi sge, %26, %27 : vector<1x256xi32>
    %29 = arith.extui %28 : vector<1x256xi1> to vector<1x256xi32>
    %30 = arith.sitofp %29 : vector<1x256xi32> to vector<1x256xf32>
    %c14_i32 = arith.constant 14 : i32
    %31 = vector.broadcast %c14_i32 : i32 to vector<1x256xi32>
    %32 = arith.cmpi sle, %26, %31 : vector<1x256xi32>
    %33 = arith.extui %32 : vector<1x256xi1> to vector<1x256xi32>
    %34 = arith.sitofp %33 : vector<1x256xi32> to vector<1x256xf32>
    %cst_10 = arith.constant 0.000000e+00 : f32
    %35 = vector.broadcast %cst_10 : f32 to vector<4x17xf32>
    %36 = vector.extract_strided_slice %9 {offsets = [0, 0], sizes = [4, 239], strides = [1, 1]} : vector<4x256xf32> to vector<4x239xf32>
    %37 = tpu.concatenate %35, %36 in 1 : vector<4x17xf32>, vector<4x239xf32> -> vector<4x256xf32>
    %38 = vector.broadcast %30 : vector<1x256xf32> to vector<4x256xf32>
    %39 = arith.mulf %37, %38 : vector<4x256xf32>
    %cst_11 = arith.constant 0.000000e+00 : f32
    %40 = vector.broadcast %cst_11 : f32 to vector<4x16xf32>
    %41 = vector.extract_strided_slice %9 {offsets = [0, 0], sizes = [4, 240], strides = [1, 1]} : vector<4x256xf32> to vector<4x240xf32>
    %42 = tpu.concatenate %40, %41 in 1 : vector<4x16xf32>, vector<4x240xf32> -> vector<4x256xf32>
    %cst_12 = arith.constant 0.000000e+00 : f32
    %43 = vector.broadcast %cst_12 : f32 to vector<4x15xf32>
    %44 = vector.extract_strided_slice %9 {offsets = [0, 0], sizes = [4, 241], strides = [1, 1]} : vector<4x256xf32> to vector<4x241xf32>
    %45 = tpu.concatenate %43, %44 in 1 : vector<4x15xf32>, vector<4x241xf32> -> vector<4x256xf32>
    %46 = vector.broadcast %34 : vector<1x256xf32> to vector<4x256xf32>
    %47 = arith.mulf %45, %46 : vector<4x256xf32>
    %cst_13 = arith.constant 0.000000e+00 : f32
    %48 = vector.broadcast %cst_13 : f32 to vector<4x1xf32>
    %49 = vector.extract_strided_slice %9 {offsets = [0, 0], sizes = [4, 255], strides = [1, 1]} : vector<4x256xf32> to vector<4x255xf32>
    %50 = tpu.concatenate %48, %49 in 1 : vector<4x1xf32>, vector<4x255xf32> -> vector<4x256xf32>
    %51 = vector.broadcast %30 : vector<1x256xf32> to vector<4x256xf32>
    %52 = arith.mulf %50, %51 : vector<4x256xf32>
    %53 = vector.extract_strided_slice %9 {offsets = [0, 1], sizes = [4, 255], strides = [1, 1]} : vector<4x256xf32> to vector<4x255xf32>
    %cst_14 = arith.constant 0.000000e+00 : f32
    %54 = vector.broadcast %cst_14 : f32 to vector<4x1xf32>
    %55 = tpu.concatenate %53, %54 in 1 : vector<4x255xf32>, vector<4x1xf32> -> vector<4x256xf32>
    %56 = vector.broadcast %34 : vector<1x256xf32> to vector<4x256xf32>
    %57 = arith.mulf %55, %56 : vector<4x256xf32>
    %58 = vector.extract_strided_slice %9 {offsets = [0, 15], sizes = [4, 241], strides = [1, 1]} : vector<4x256xf32> to vector<4x241xf32>
    %cst_15 = arith.constant 0.000000e+00 : f32
    %59 = vector.broadcast %cst_15 : f32 to vector<4x15xf32>
    %60 = tpu.concatenate %58, %59 in 1 : vector<4x241xf32>, vector<4x15xf32> -> vector<4x256xf32>
    %61 = vector.broadcast %30 : vector<1x256xf32> to vector<4x256xf32>
    %62 = arith.mulf %60, %61 : vector<4x256xf32>
    %63 = vector.extract_strided_slice %9 {offsets = [0, 16], sizes = [4, 240], strides = [1, 1]} : vector<4x256xf32> to vector<4x240xf32>
    %cst_16 = arith.constant 0.000000e+00 : f32
    %64 = vector.broadcast %cst_16 : f32 to vector<4x16xf32>
    %65 = tpu.concatenate %63, %64 in 1 : vector<4x240xf32>, vector<4x16xf32> -> vector<4x256xf32>
    %66 = vector.extract_strided_slice %9 {offsets = [0, 17], sizes = [4, 239], strides = [1, 1]} : vector<4x256xf32> to vector<4x239xf32>
    %cst_17 = arith.constant 0.000000e+00 : f32
    %67 = vector.broadcast %cst_17 : f32 to vector<4x17xf32>
    %68 = tpu.concatenate %66, %67 in 1 : vector<4x239xf32>, vector<4x17xf32> -> vector<4x256xf32>
    %69 = vector.broadcast %34 : vector<1x256xf32> to vector<4x256xf32>
    %70 = arith.mulf %68, %69 : vector<4x256xf32>
    %71 = tpu.concatenate %39, %42, %47, %52, %9, %57, %62, %65, %70 in 0 : vector<4x256xf32>, vector<4x256xf32>, vector<4x256xf32>, vector<4x256xf32>, vector<4x256xf32>, vector<4x256xf32>, vector<4x256xf32>, vector<4x256xf32>, vector<4x256xf32> -> vector<36x256xf32>
    %c0_18 = arith.constant 0 : index
    %c0_19 = arith.constant 0 : index
    %72 = vector.load %arg4[%c0_18, %c0_19] : memref<4x36xf32, #tpu.memory_space<vmem>>, vector<4x36xf32>
    %cst_20 = arith.constant dense<0.000000e+00> : vector<4x256xf32>
    %73 = tpu.matmul %72, %71, %cst_20 {dimension_numbers = #tpu.dot_dimension_numbers<[1], [0], [0], [1], [0, 0, 1, 1], [], []>} : vector<4x36xf32>, vector<36x256xf32>, vector<4x256xf32> -> vector<4x256xf32>
    %c0_21 = arith.constant 0 : index
    %c0_22 = arith.constant 0 : index
    %74 = vector.load %arg5[%c0_21, %c0_22] : memref<4x1xf32, #tpu.memory_space<vmem>>, vector<4x1xf32>
    %75 = vector.broadcast %74 : vector<4x1xf32> to vector<4x256xf32>
    %76 = arith.addf %73, %75 : vector<4x256xf32>
    %c0_23 = arith.constant 0 : index
    %c0_24 = arith.constant 0 : index
    %c0_25 = arith.constant 0 : index
    %77 = vector.load %arg6[%c0_23, %c0_24, %c0_25] : memref<1x4x256xf32, #tpu.memory_space<vmem>>, vector<1x4x256xf32>
    %78 = vector.shape_cast %77 : vector<1x4x256xf32> to vector<4x256xf32>
    %79 = arith.addf %76, %78 : vector<4x256xf32>
    %cst_26 = arith.constant 0.000000e+00 : f32
    %80 = vector.broadcast %cst_26 : f32 to vector<4x256xf32>
    %81 = arith.maximumf %79, %80 : vector<4x256xf32>
    %c0_27 = arith.constant 0 : index
    %c0_28 = arith.constant 0 : index
    %c0_29 = arith.constant 0 : index
    %82 = vector.load %arg7[%c0_27, %c0_28, %c0_29] : memref<1x4x256xf32, #tpu.memory_space<vmem>>, vector<1x4x256xf32>
    %83 = vector.shape_cast %82 : vector<1x4x256xf32> to vector<4x256xf32>
    %84 = vector.shape_cast %81 : vector<4x256xf32> to vector<1x4x256xf32>
    tpu.vector_store %arg7[%c0_27, %c0_28, %c0_29], %84 {strides = array<i32>} : memref<1x4x256xf32, #tpu.memory_space<vmem>>, vector<1x4x256xf32>,
    return
  }
  func.func @transform_0(%arg0: i32) -> (i32, i32, i32) {
    %c0_i32 = arith.constant 0 : i32
    %c0_i32_0 = arith.constant 0 : i32
    %c0_i32_1 = arith.constant 0 : i32
    return %arg0, %c0_i32, %c0_i32_0 : i32, i32, i32
  }
  func.func @transform_1(%arg0: i32) -> (i32, i32) {
    %c0_i32 = arith.constant 0 : i32
    %c0_i32_0 = arith.constant 0 : i32
    %c0_i32_1 = arith.constant 0 : i32
    return %c0_i32, %c0_i32_0 : i32, i32
  }
  func.func @transform_2(%arg0: i32) -> (i32, i32) {
    %c0_i32 = arith.constant 0 : i32
    %c0_i32_0 = arith.constant 0 : i32
    %c0_i32_1 = arith.constant 0 : i32
    return %c0_i32, %c0_i32_0 : i32, i32
  }
  func.func @transform_3(%arg0: i32) -> (i32, i32) {
    %c0_i32 = arith.constant 0 : i32
    %c0_i32_0 = arith.constant 0 : i32
    %c0_i32_1 = arith.constant 0 : i32
    return %c0_i32, %c0_i32_0 : i32, i32
  }
  func.func @transform_4(%arg0: i32) -> (i32, i32) {
    %c0_i32 = arith.constant 0 : i32
    %c0_i32_0 = arith.constant 0 : i32
    %c0_i32_1 = arith.constant 0 : i32
    return %c0_i32, %c0_i32_0 : i32, i32
  }
  func.func @transform_5(%arg0: i32) -> (i32, i32, i32) {
    %c0_i32 = arith.constant 0 : i32
    %c0_i32_0 = arith.constant 0 : i32
    %c0_i32_1 = arith.constant 0 : i32
    return %arg0, %c0_i32, %c0_i32_0 : i32, i32, i32
  }
  func.func @transform_6(%arg0: i32) -> (i32, i32, i32) {
    %c0_i32 = arith.constant 0 : i32
    %c0_i32_0 = arith.constant 0 : i32
    %c0_i32_1 = arith.constant 0 : i32
    return %arg0, %c0_i32, %c0_i32_0 : i32, i32, i32
  }
}

module attributes {stable_mosaic.version = 11 : i64} {
  func.func @_front_kernel(%arg0: i32, %arg1: memref<1x4x256xf32, #tpu.memory_space<vmem>>, %arg2: memref<4x36xf32, #tpu.memory_space<vmem>>, %arg3: memref<4x1xf32, #tpu.memory_space<vmem>>, %arg4: memref<1x4x256xf32, #tpu.memory_space<vmem>>, %arg5: memref<1x4x2xf32, #tpu.memory_space<vmem>>) attributes {dimension_semantics = [#tpu.dimension_semantics<parallel>], iteration_bounds = array<i64: 2>, scalar_prefetch = 0 : i64, scratch_operands = 0 : i64, tpu.core_type = #tpu.core_type<tc>, window_params = [{transform_indices = @transform_0, window_bounds = array<i64: 1, 4, 256>}, {pipeline_mode = #tpu.pipeline_mode<synchronous>, transform_indices = @transform_1, window_bounds = array<i64: 4, 36>}, {pipeline_mode = #tpu.pipeline_mode<synchronous>, transform_indices = @transform_2, window_bounds = array<i64: 4, 1>}, {transform_indices = @transform_3, window_bounds = array<i64: 1, 4, 256>}, {transform_indices = @transform_4, window_bounds = array<i64: 1, 4, 2>}]} {
    %c0 = arith.constant 0 : index
    %c0_0 = arith.constant 0 : index
    %c0_1 = arith.constant 0 : index
    %0 = vector.load %arg1[%c0, %c0_0, %c0_1] : memref<1x4x256xf32, #tpu.memory_space<vmem>>, vector<1x4x256xf32>
    %1 = vector.shape_cast %0 : vector<1x4x256xf32> to vector<4x256xf32>
    %2 = tpu.iota {dimensions = array<i32: 1>} : vector<1x256xi32>
    %c16_i32 = arith.constant 16 : i32
    %c0_i32 = arith.constant 0 : i32
    %3 = arith.cmpi eq, %c16_i32, %c0_i32 : i32
    %c1_i32 = arith.constant 1 : i32
    %4 = arith.select %3, %c1_i32, %c16_i32 : i32
    %5 = vector.broadcast %4 : i32 to vector<1x256xi32>
    %6 = arith.remsi %2, %5 : vector<1x256xi32>
    %c0_i32_2 = arith.constant 0 : i32
    %7 = vector.broadcast %c0_i32_2 : i32 to vector<1x256xi32>
    %8 = arith.cmpi ne, %6, %7 : vector<1x256xi32>
    %c0_i32_3 = arith.constant 0 : i32
    %9 = vector.broadcast %c0_i32_3 : i32 to vector<1x256xi32>
    %10 = arith.cmpi slt, %6, %9 : vector<1x256xi32>
    %c0_i32_4 = arith.constant 0 : i32
    %11 = arith.cmpi slt, %4, %c0_i32_4 : i32
    %12 = vector.broadcast %11 : i1 to vector<1x256xi1>
    %13 = vector.broadcast %12 : vector<1x256xi1> to vector<1x256xi1>
    %14 = arith.xori %10, %13 : vector<1x256xi1>
    %15 = arith.andi %14, %8 : vector<1x256xi1>
    %16 = vector.broadcast %4 : i32 to vector<1x256xi32>
    %17 = arith.addi %6, %16 : vector<1x256xi32>
    %18 = arith.select %15, %17, %6 : vector<1x256xi1>, vector<1x256xi32>
    %c1_i32_5 = arith.constant 1 : i32
    %19 = vector.broadcast %c1_i32_5 : i32 to vector<1x256xi32>
    %20 = arith.cmpi sge, %18, %19 : vector<1x256xi32>
    %21 = arith.extui %20 : vector<1x256xi1> to vector<1x256xi32>
    %22 = arith.sitofp %21 : vector<1x256xi32> to vector<1x256xf32>
    %c14_i32 = arith.constant 14 : i32
    %23 = vector.broadcast %c14_i32 : i32 to vector<1x256xi32>
    %24 = arith.cmpi sle, %18, %23 : vector<1x256xi32>
    %25 = arith.extui %24 : vector<1x256xi1> to vector<1x256xi32>
    %26 = arith.sitofp %25 : vector<1x256xi32> to vector<1x256xf32>
    %cst = arith.constant 0.000000e+00 : f32
    %27 = vector.broadcast %cst : f32 to vector<4x17xf32>
    %28 = vector.extract_strided_slice %1 {offsets = [0, 0], sizes = [4, 239], strides = [1, 1]} : vector<4x256xf32> to vector<4x239xf32>
    %29 = tpu.concatenate %27, %28 in 1 : vector<4x17xf32>, vector<4x239xf32> -> vector<4x256xf32>
    %30 = vector.broadcast %22 : vector<1x256xf32> to vector<4x256xf32>
    %31 = arith.mulf %29, %30 : vector<4x256xf32>
    %cst_6 = arith.constant 0.000000e+00 : f32
    %32 = vector.broadcast %cst_6 : f32 to vector<4x16xf32>
    %33 = vector.extract_strided_slice %1 {offsets = [0, 0], sizes = [4, 240], strides = [1, 1]} : vector<4x256xf32> to vector<4x240xf32>
    %34 = tpu.concatenate %32, %33 in 1 : vector<4x16xf32>, vector<4x240xf32> -> vector<4x256xf32>
    %cst_7 = arith.constant 0.000000e+00 : f32
    %35 = vector.broadcast %cst_7 : f32 to vector<4x15xf32>
    %36 = vector.extract_strided_slice %1 {offsets = [0, 0], sizes = [4, 241], strides = [1, 1]} : vector<4x256xf32> to vector<4x241xf32>
    %37 = tpu.concatenate %35, %36 in 1 : vector<4x15xf32>, vector<4x241xf32> -> vector<4x256xf32>
    %38 = vector.broadcast %26 : vector<1x256xf32> to vector<4x256xf32>
    %39 = arith.mulf %37, %38 : vector<4x256xf32>
    %cst_8 = arith.constant 0.000000e+00 : f32
    %40 = vector.broadcast %cst_8 : f32 to vector<4x1xf32>
    %41 = vector.extract_strided_slice %1 {offsets = [0, 0], sizes = [4, 255], strides = [1, 1]} : vector<4x256xf32> to vector<4x255xf32>
    %42 = tpu.concatenate %40, %41 in 1 : vector<4x1xf32>, vector<4x255xf32> -> vector<4x256xf32>
    %43 = vector.broadcast %22 : vector<1x256xf32> to vector<4x256xf32>
    %44 = arith.mulf %42, %43 : vector<4x256xf32>
    %45 = vector.extract_strided_slice %1 {offsets = [0, 1], sizes = [4, 255], strides = [1, 1]} : vector<4x256xf32> to vector<4x255xf32>
    %cst_9 = arith.constant 0.000000e+00 : f32
    %46 = vector.broadcast %cst_9 : f32 to vector<4x1xf32>
    %47 = tpu.concatenate %45, %46 in 1 : vector<4x255xf32>, vector<4x1xf32> -> vector<4x256xf32>
    %48 = vector.broadcast %26 : vector<1x256xf32> to vector<4x256xf32>
    %49 = arith.mulf %47, %48 : vector<4x256xf32>
    %50 = vector.extract_strided_slice %1 {offsets = [0, 15], sizes = [4, 241], strides = [1, 1]} : vector<4x256xf32> to vector<4x241xf32>
    %cst_10 = arith.constant 0.000000e+00 : f32
    %51 = vector.broadcast %cst_10 : f32 to vector<4x15xf32>
    %52 = tpu.concatenate %50, %51 in 1 : vector<4x241xf32>, vector<4x15xf32> -> vector<4x256xf32>
    %53 = vector.broadcast %22 : vector<1x256xf32> to vector<4x256xf32>
    %54 = arith.mulf %52, %53 : vector<4x256xf32>
    %55 = vector.extract_strided_slice %1 {offsets = [0, 16], sizes = [4, 240], strides = [1, 1]} : vector<4x256xf32> to vector<4x240xf32>
    %cst_11 = arith.constant 0.000000e+00 : f32
    %56 = vector.broadcast %cst_11 : f32 to vector<4x16xf32>
    %57 = tpu.concatenate %55, %56 in 1 : vector<4x240xf32>, vector<4x16xf32> -> vector<4x256xf32>
    %58 = vector.extract_strided_slice %1 {offsets = [0, 17], sizes = [4, 239], strides = [1, 1]} : vector<4x256xf32> to vector<4x239xf32>
    %cst_12 = arith.constant 0.000000e+00 : f32
    %59 = vector.broadcast %cst_12 : f32 to vector<4x17xf32>
    %60 = tpu.concatenate %58, %59 in 1 : vector<4x239xf32>, vector<4x17xf32> -> vector<4x256xf32>
    %61 = vector.broadcast %26 : vector<1x256xf32> to vector<4x256xf32>
    %62 = arith.mulf %60, %61 : vector<4x256xf32>
    %63 = tpu.concatenate %31, %34, %39, %44, %1, %49, %54, %57, %62 in 0 : vector<4x256xf32>, vector<4x256xf32>, vector<4x256xf32>, vector<4x256xf32>, vector<4x256xf32>, vector<4x256xf32>, vector<4x256xf32>, vector<4x256xf32>, vector<4x256xf32> -> vector<36x256xf32>
    %c0_13 = arith.constant 0 : index
    %c0_14 = arith.constant 0 : index
    %64 = vector.load %arg2[%c0_13, %c0_14] : memref<4x36xf32, #tpu.memory_space<vmem>>, vector<4x36xf32>
    %cst_15 = arith.constant dense<0.000000e+00> : vector<4x256xf32>
    %65 = tpu.matmul %64, %63, %cst_15 {dimension_numbers = #tpu.dot_dimension_numbers<[1], [0], [0], [1], [0, 0, 1, 1], [], []>} : vector<4x36xf32>, vector<36x256xf32>, vector<4x256xf32> -> vector<4x256xf32>
    %c0_16 = arith.constant 0 : index
    %c0_17 = arith.constant 0 : index
    %66 = vector.load %arg3[%c0_16, %c0_17] : memref<4x1xf32, #tpu.memory_space<vmem>>, vector<4x1xf32>
    %67 = vector.broadcast %66 : vector<4x1xf32> to vector<4x256xf32>
    %68 = arith.addf %65, %67 : vector<4x256xf32>
    %c0_18 = arith.constant 0 : index
    %c0_19 = arith.constant 0 : index
    %c0_20 = arith.constant 0 : index
    %69 = vector.load %arg4[%c0_18, %c0_19, %c0_20] : memref<1x4x256xf32, #tpu.memory_space<vmem>>, vector<1x4x256xf32>
    %70 = vector.shape_cast %69 : vector<1x4x256xf32> to vector<4x256xf32>
    %71 = vector.shape_cast %68 : vector<4x256xf32> to vector<1x4x256xf32>
    tpu.vector_store %arg4[%c0_18, %c0_19, %c0_20], %71 {strides = array<i32>} : memref<1x4x256xf32, #tpu.memory_space<vmem>>, vector<1x4x256xf32>,
    %cst_21 = arith.constant dense<0.000000e+00> : vector<4xf32>
    %72 = vector.multi_reduction <add>, %68, %cst_21 [1] : vector<4x256xf32> to vector<4xf32>
    %73 = vector.shape_cast %72 : vector<4xf32> to vector<4x1xf32>
    %74 = arith.mulf %68, %68 : vector<4x256xf32>
    %cst_22 = arith.constant dense<0.000000e+00> : vector<4xf32>
    %75 = vector.multi_reduction <add>, %74, %cst_22 [1] : vector<4x256xf32> to vector<4xf32>
    %76 = vector.shape_cast %75 : vector<4xf32> to vector<4x1xf32>
    %77 = tpu.concatenate %73, %76 in 1 : vector<4x1xf32>, vector<4x1xf32> -> vector<4x2xf32>
    %c0_23 = arith.constant 0 : index
    %c0_24 = arith.constant 0 : index
    %c0_25 = arith.constant 0 : index
    %78 = vector.load %arg5[%c0_23, %c0_24, %c0_25] : memref<1x4x2xf32, #tpu.memory_space<vmem>>, vector<1x4x2xf32>
    %79 = vector.shape_cast %78 : vector<1x4x2xf32> to vector<4x2xf32>
    %80 = vector.shape_cast %77 : vector<4x2xf32> to vector<1x4x2xf32>
    tpu.vector_store %arg5[%c0_23, %c0_24, %c0_25], %80 {strides = array<i32>} : memref<1x4x2xf32, #tpu.memory_space<vmem>>, vector<1x4x2xf32>,
    return
  }
  func.func @transform_0(%arg0: i32) -> (i32, i32, i32) {
    %c0_i32 = arith.constant 0 : i32
    %c0_i32_0 = arith.constant 0 : i32
    %c0_i32_1 = arith.constant 0 : i32
    return %arg0, %c0_i32, %c0_i32_0 : i32, i32, i32
  }
  func.func @transform_1(%arg0: i32) -> (i32, i32) {
    %c0_i32 = arith.constant 0 : i32
    %c0_i32_0 = arith.constant 0 : i32
    %c0_i32_1 = arith.constant 0 : i32
    return %c0_i32, %c0_i32_0 : i32, i32
  }
  func.func @transform_2(%arg0: i32) -> (i32, i32) {
    %c0_i32 = arith.constant 0 : i32
    %c0_i32_0 = arith.constant 0 : i32
    %c0_i32_1 = arith.constant 0 : i32
    return %c0_i32, %c0_i32_0 : i32, i32
  }
  func.func @transform_3(%arg0: i32) -> (i32, i32, i32) {
    %c0_i32 = arith.constant 0 : i32
    %c0_i32_0 = arith.constant 0 : i32
    %c0_i32_1 = arith.constant 0 : i32
    return %arg0, %c0_i32, %c0_i32_0 : i32, i32, i32
  }
  func.func @transform_4(%arg0: i32) -> (i32, i32, i32) {
    %c0_i32 = arith.constant 0 : i32
    %c0_i32_0 = arith.constant 0 : i32
    %c0_i32_1 = arith.constant 0 : i32
    return %arg0, %c0_i32, %c0_i32_0 : i32, i32, i32
  }
}

</mosaic_0001>

<bundles_post_ra>
// kernel: residual_block_forward.2
= control target key start
LH: loop header
LB: loop body
LE: loop exit
PB: predicated region body
PF: predicated region fallthrough
CT: control target
= control target key end

     0   :  { %s661_s15 = smov 0   ;;  %s752_s0 = inlined_call_operand.vmem [shape: f32[2,4,256], index: 0, kind: input, shape index: {}]   ;;  %s753_s1 = inlined_call_operand.vmem [shape: f32[4,36], index: 1, kind: input, shape index: {}]   ;;  %s754_s2 = inlined_call_operand.vmem [shape: f32[4,1], index: 2, kind: input, shape index: {}]   ;;  %s755_s3 = inlined_call_operand.vmem [shape: f32[2,4,256], index: 3, kind: output, shape index: {0}]   ;;  %s756_s4 = inlined_call_operand.vmem [shape: f32[2,4,2], index: 4, kind: output, shape index: {1}]  }
   0x1 LB: > { %s559_s16 = sadd.s32 4294967295, %s624_s15   ;;  %p563_p0 = scmp.ge.s32.totalorder %s624_s15, 1  ;;  %s624_s15 = sphi %s661_s15, %s15_s15  }
   0x2   : > { %p165_p1 = scmp.lt.s32.totalorder %s624_s15, 3 }
   0x4   : > { %p166_p2 = pnand %p563_p0, %p165_p1 }
   0x5   : > { %p195_p3 = scmp.lt.s32.totalorder (!%p166_p2), %s559_s16, 1  ;;  %v626_v0 = vmov (!%p166_p2), 0.0   ;;  %s627_s21 = smov (!%p166_p2), 17   ;;  %v634_v5 = vmov (!%p166_p2), 0   ;;  %v366_v6 = vld [vmem:[%s754_s2] sm:$0xf] (!%p166_p2)  ;;  %v210_v7 = vlaneseq (!%p166_p2) }
   0x6   : > { %169 = sbr.rel (%p166_p2) target bundleno = 530 (0x212), region = 32  ;;  %446 = vmatprep.mubr.f32.mxu0 (!%p166_p2), %v626_v0  ;;  %s628_s22 = smov (!%p166_p2), 1   ;;  %616 = vset.pattern.permute.xlu0 (!%p166_p2), %v634_v5  ;;  %vm285_vm2 = vcmask (!%p166_p2), 7168   ;;  %vm255_vm3 = vcmask (!%p166_p2), 138240   ;;  %vm274_vm5 = vcmask (!%p166_p2), 121856   ;;  %vm266_vm7 = vcmask (!%p166_p2), 130048  }
   0x7   : > { %s629_s23 = smov (!%p166_p2), 15   ;;  %s630_s24 = smov (!%p166_p2), 16   ;;  %v211_v8 = vand.u32 (!%p166_p2), 127, %v210_v7  ;;  %vm296_vm8 = vcmask (!%p166_p2), 1039360   ;;  %vm356_vm9 = vcmask (!%p166_p2), 1043456   ;;  %vm307_vm10 = vcmask (!%p166_p2), 924672  }
   0x8   : > { %s631_s25 = smov (!%p166_p2), 127   ;;  %s632_s26 = smov (!%p166_p2), 113   ;;  %vm318_vm11 = vcmask (!%p166_p2), 916480   ;;  %vm326_vm12 = vcmask (!%p166_p2), 908288   ;;  %vm372_vm13 = vcmask (!%p166_p2), 293888   ;;  %vm471_vm14 = vcmask (!%p166_p2), 11264  }
   0x9   : > { %s633_s27 = smov (!%p166_p2), 112   ;;  %s635_s28 = smov (!%p166_p2), 111   ;;  %v212_v9 = vadd.s32 (!%p166_p2), 128, %v211_v8  ;;  %v217_v13 = vand.u32 (!%p166_p2), 15, %v211_v8 }
   0xb   : > { %v224_v12 = vand.u32 (!%p166_p2), 15, %v212_v9  ;;  %vm237_vm1 = vcmp.ge.s32.totalorder (!%p166_p2), %v217_v13, 1  ;;  %vm243_vm4 = vcmp.le.s32.totalorder (!%p166_p2), %v217_v13, 14 }
   0xc   : > { %v569_v18 = vsel (!%p166_p2), %vm237_vm1, 1.0, %v626_v0  ;;  %v708_v22 = vsel (!%p166_p2), %vm243_vm4, 1.0, %v626_v0 }
   0xd   : > { %s758_s16 = smov (!%p195_p3, %s559_s16), 1  ;;  %vm238_vm0 = vcmp.ge.s32.totalorder %v224_v12, 1  ;;  %vm244_vm6 = vcmp.le.s32.totalorder %v224_v12, 14 }
   0xe   : > { %s578_s17 = sshll.u32 %s758_s16, 3  ;;  %v570_v16 = vsel %vm238_vm0, 1.0, %v626_v0  ;;  %v572_v28 = vsel %vm244_vm6, 1.0, %v626_v0  ;;  %s568_s10 = sshll.u32 %s758_s16, 2 }
   0xf   : > { %s199_s20 = scalar_lea.vmem %s752_s0, %s578_s17  ;;  %s204_s9 = scalar_lea.vmem %s755_s3, %s578_s17 }
  0x10   : > { %v678_v1 = vld [vmem:[%s199_s20] sm:$0xff]  ;;  %s208_s13 = scalar_lea.vmem %s756_s4, %s568_s10 }
  0x11   : > { %251 = vrot.lane.b32.xlu1 %v678_v1, %s627_s21  ;;  %281 = vrot.lane.b32.xlu0 %v678_v1, %s628_s22  ;;  %v684_v2 = vcombine.high %v678_v1, %v678_v1 }
  0x13   : > { %v606_v3 = vpack.i.bf16 %v684_v2, %v678_v1  ;;  %v611_v4 = vpack.i.bf16 %v678_v1, %v684_v2 }
  0x15   : > { %270 = vrot.lane.b32.xlu1 %v678_v1, %s629_s23  ;;  %283 = vrot.lane.b32.xlu0 %v684_v2, %s628_s22 }
  0x19   : > { %253 = vrot.lane.b32.xlu1 %v684_v2, %s627_s21  ;;  %607 = vrot.lane.b32.xlu0 %v606_v3, %s630_s24 }
  0x1d   : > { %294 = vrot.lane.b32.xlu1 %v684_v2, %s631_s25  ;;  %272 = vrot.lane.b32.xlu0 %v684_v2, %s629_s23 }
  0x21   : > { %305 = vrot.lane.b32.xlu1 %v684_v2, %s632_s26  ;;  %292 = vrot.lane.b32.xlu0 %v678_v1, %s631_s25 }
  0x25   : > { %303 = vrot.lane.b32.xlu1 %v678_v1, %s632_s26  ;;  %612 = vrot.lane.b32.xlu0 %v611_v4, %s633_s27 }
  0x29   : > { %322 = vrot.lane.b32.xlu1 %v678_v1, %s635_s28  ;;  %324 = vrot.lane.b32.xlu0 %v684_v2, %s635_s28 }
  0x2d   : > { %369 = vperm.xlu0 %616, %v366_v6  }
  0x83   : > { %v252_v10 = vpop.permute.xlu1 %251  ;;  %v282_v11 = vpop.permute.xlu0 %281 }
  0x84   : > { %v289_v19 = vsel %vm285_vm2, 0.0, %v282_v11  ;;  %v259_v25 = vsel %vm255_vm3, 0.0, %v252_v10 }
  0x85   : > { %v290_v29 = vmul.f32 %v569_v18, %v289_v19  ;;  %v260_v37 = vmul.f32 %v569_v18, %v259_v25 }
  0x87   : > { %v271_v14 = vpop.permute.xlu1 %270  ;;  %v284_v15 = vpop.permute.xlu0 %283  ;;  %v340_v43 = vrot.slane %v290_v29, 4 }
  0x88   : > { %v286_v17 = vsel %vm285_vm2, %v282_v11, %v284_v15  ;;  %v278_v26 = vsel %vm274_vm5, 0.0, %v271_v14 }
  0x89   : > { %v291_v27 = vmul.f32 %v570_v16, %v286_v17  ;;  %v279_v38 = vmul.f32 %v708_v22, %v278_v26 }
  0x8b   : > { %v254_v20 = vpop.permute.xlu1 %253  ;;  %v608_v21 = vpop.permute.xlu0 %607  ;;  %v341_v40 = vrot.slane %v291_v27, 4  ;;  %v359_v52 = vsel %vm356_vm9, %v279_v38, %v340_v43 }
  0x8c   : > { %v610_v23 = vunpack.i.h.bf16 %v608_v21  ;;  %v609_v24 = vunpack.i.l.bf16 %v608_v21  ;;  %v256_v30 = vsel %vm255_vm3, %v252_v10, %v254_v20 }
  0x8d   : > { %v261_v41 = vmul.f32 %v570_v16, %v256_v30 }
  0x8e   : > { %v269_v31 = vsel %vm266_vm7, 0.0, %v609_v24  ;;  %v267_v32 = vsel %vm266_vm7, %v609_v24, %v610_v23 }
  0x8f   : > { %v334_v33 = vrot.slane %v269_v31, 4  ;;  %v295_v34 = vpop.permute.xlu1 %294  ;;  %v273_v35 = vpop.permute.xlu0 %272  ;;  %v335_v36 = vrot.slane %v267_v32, 4 }
  0x90   : > { %v275_v39 = vsel %vm274_vm5, %v271_v14, %v273_v35  ;;  %v300_v44 = vsel %vm296_vm8, %v295_v34, 0.0 }
  0x91   : > { %v280_v42 = vmul.f32 %v572_v28, %v275_v39  ;;  %v357_v45 = vsel %vm356_vm9, %v260_v37, %v334_v33  ;;  %v358_v48 = vsel %vm356_vm9, %v261_v41, %v335_v36  ;;  %v302_v53 = vmul.f32 %v572_v28, %v300_v44 }
  0x92   : > { %v582_v55 = vpack.c.bf16 %v359_v52, %v357_v45 }
  0x93   : > { %v306_v46 = vpop.permute.xlu1 %305  ;;  %v293_v47 = vpop.permute.xlu0 %292  ;;  %v360_v49 = vsel %vm356_vm9, %v280_v42, %v341_v40  ;;  %v348_v62 = vrot.slane %v302_v53, 4 }
  0x94   : > { %v297_v50 = vsel %vm296_vm8, %v293_v47, %v295_v34  ;;  %v580_v51 = vpack.c.bf16 %v360_v49, %v358_v48  ;;  %v311_v58 = vsel %vm307_vm10, %v306_v46, 0.0 }
  0x95   : > { %v301_v54 = vmul.f32 %v708_v22, %v297_v50  ;;  %v313_v4 = vmul.f32 %v570_v16, %v311_v58  ;;  %v362_v11 = vsel %vm356_vm9, %v684_v2, %v348_v62  ;;  %v365_v2 = vld [vmem:[%s753_s1] sm:$0xf] }
  0x96   : > { %581 = vmatprep.subr.bf16.mxu0 %v580_v51 }
  0x97   : > { %v304_v56 = vpop.permute.xlu1 %303  ;;  %v613_v57 = vpop.permute.xlu0 %612  ;;  %583 = vmatpush1.bf16.msra.mxu0 %v582_v55  ;;  %v347_v63 = vrot.slane %v301_v54, 4 }
  0x98   : > { %v308_v59 = vsel %vm307_vm10, %v304_v56, %v306_v46  ;;  %v615_v60 = vunpack.i.h.bf16 %v613_v57  ;;  %v614_v61 = vunpack.i.l.bf16 %v613_v57 }
  0x99   : > { %v312_v5 = vmul.f32 %v569_v18, %v308_v59  ;;  %v361_v13 = vsel %vm356_vm9, %v678_v1, %v347_v63 }
  0x9a   : > { %v319_v0 = vsel %vm318_vm11, %v615_v60, %v614_v61  ;;  %v321_v3 = vsel %vm318_vm11, %v614_v61, 0.0 }
  0x9b   : > { %v352_v6 = vrot.slane %v319_v0, 4  ;;  %v353_v7 = vrot.slane %v321_v3, 4  ;;  %v323_v8 = vpop.permute.xlu1 %322  ;;  %v325_v9 = vpop.permute.xlu0 %324 }
  0x9c   : > { %v330_v10 = vsel %vm326_vm12, %v325_v9, 0.0  ;;  %v327_v15 = vsel %vm326_vm12, %v323_v8, %v325_v9 }
  0x9d   : > { %v364_v12 = vsel %vm356_vm9, %v313_v4, %v353_v7  ;;  %v363_v14 = vsel %vm356_vm9, %v312_v5, %v352_v6  ;;  %v332_v17 = vmul.f32 %v572_v28, %v330_v10  ;;  %v331_v19 = vmul.f32 %v708_v22, %v327_v15 }
  0x9e   : > { %v584_v16 = vpack.c.bf16 %v364_v12, %v362_v11  ;;  %v586_v18 = vpack.c.bf16 %v363_v14, %v361_v13 }
  0xa0   : > { %585 = vmatprep.subr.bf16.mxu0 %v584_v16 }
  0xa1   : > { %587 = vmatpush1.bf16.msra.mxu0 %v586_v18 }
  0xa2   : > { %573 = vmatprep.subr.msk.mxu0 %vm356_vm9, %v332_v17 }
  0xa5   : > { %574 = vmatpush1.msk.msra.mxu0 %vm356_vm9, %v331_v19 }
  0xa6   : > { %575 = vmatmul.mubr.msk.f32.vlgmr.msra.gmra.mrb[0].mxu0 %vm372_vm13, %v365_v2 }
  0xac   : > { %v370_v1 = vpop.permute.xlu0 %369 }
 0x179   : > { %v448_v20 = vpop.f32.mrb[0].mxu0 }
 0x17a   : > { %v449_v21 = vadd.f32 %v448_v20, %v370_v1  ;;  %v450_v23 = vpop.f32.mrb[1].mxu0 }
 0x17b   : > { %v451_v24 = vadd.f32 %v450_v23, %v370_v1 }
 0x17c   : > { %v458_v22 = vsel %vm356_vm9, %v449_v21, 0.0  ;;  %v463_v25 = vmul.f32 %v449_v21, %v449_v21 }
 0x17d   : > { %v455_v26 = vcombine.low %v449_v21, %v451_v24  ;;  %v459_v27 = vsel %vm356_vm9, %v451_v24, 0.0  ;;  %v464_v28 = vmul.f32 %v451_v24, %v451_v24 }
 0x17e   : > { %v460_v29 = vadd.f32 %v459_v27, %v458_v22  ;;  %v465_v30 = vsel %vm356_vm9, %v463_v25, 0.0 }
 0x17f   : > { %457 = vst [vmem:[%s204_s9] sm:$0xff] %v455_v26  ;;  %v466_v31 = vsel %vm356_vm9, %v464_v28, 0.0 }
 0x180   : > { %461 = vadd.xlane.f32.xlu1 %v460_v29  ;;  %v467_v32 = vadd.f32 %v466_v31, %v465_v30 }
 0x182   : > { %468 = vadd.xlane.f32.xlu0 %v467_v32 }
 0x20d   : > { %v462_v33 = vpop.xlane.xlu1 %461 }
 0x20f   : > { %v469_v34 = vpop.xlane.xlu0 %468 }
 0x210   : > { %v470_v35 = vsel %vm285_vm2, %v462_v33, %v469_v34 }
 0x211   : > { %472 = vst.msk [vmem:[%s208_s13] sm:$0xf] %vm471_vm14, %v470_v35 }
 0x212 PF: > { %s15_s15 = sadd.s32 1, %s624_s15  }
 0x213   : > { %p12_p4 = scmp.ge.s32.totalorder %s15_s15, 4  }
 0x215   :  { %14 = sbr.rel (!%p12_p4) target bundleno = 1 (0x1), region = 74 }

// kernel: residual_block_forward.3
= control target key start
LH: loop header
LB: loop body
LE: loop exit
PB: predicated region body
PF: predicated region fallthrough
CT: control target
= control target key end

     0   :  { %s741_s21 = smov 0   ;;  %s839_s0 = inlined_call_operand.vmem [shape: f32[2,4,256], index: 0, kind: input, shape index: {}]   ;;  %s840_s1 = inlined_call_operand.vmem [shape: f32[4,1], index: 1, kind: input, shape index: {}]   ;;  %s841_s2 = inlined_call_operand.vmem [shape: f32[4,1], index: 2, kind: input, shape index: {}]   ;;  %s842_s3 = inlined_call_operand.vmem [shape: f32[4,36], index: 3, kind: input, shape index: {}]   ;;  %s843_s4 = inlined_call_operand.vmem [shape: f32[4,1], index: 4, kind: input, shape index: {}]   ;;  %s844_s5 = inlined_call_operand.vmem [shape: f32[2,4,256], index: 5, kind: input, shape index: {}]   ;;  %s845_s6 = inlined_call_operand.vmem [shape: f32[2,4,256], index: 6, kind: output, shape index: {}]  }
   0x1 LB: > { %s625_s22 = sadd.s32 4294967295, %s693_s21   ;;  %p629_p0 = scmp.ge.s32.totalorder %s693_s21, 1  ;;  %s693_s21 = sphi %s741_s21, %s16_s21  }
   0x2   : > { %p222_p1 = scmp.lt.s32.totalorder %s693_s21, 3 }
   0x4   : > { %p223_p2 = pnand %p629_p0, %p222_p1 }
   0x5   : > { %v273_v0 = vld [vmem:[%s840_s1] sm:$0xf] (!%p223_p2)  ;;  %v695_v1 = vmov (!%p223_p2), 0   ;;  %v696_v3 = vmov (!%p223_p2), 0.0   ;;  %p257_p3 = scmp.lt.s32.totalorder (!%p223_p2), %s625_s22, 1  ;;  %v281_v6 = vlaneseq (!%p223_p2)  ;;  %s698_s7 = smov (!%p223_p2), 17  }
   0x6   : > { %226 = sbr.rel (%p223_p2) target bundleno = 517 (0x205), region = 44  ;;  %675 = vset.pattern.permute.xlu0 (!%p223_p2), %v695_v1  ;;  %v287_v2 = vld [vmem:[%s841_s2] sm:$0xf] (!%p223_p2)  ;;  %538 = vmatprep.mubr.f32.mxu0 (!%p223_p2), %v696_v3  ;;  %v697_v4 = vmov (!%p223_p2), 839922192   ;;  %s699_s8 = smov (!%p223_p2), 1  }
   0x7   : > { %276 = vperm.xlu0 (!%p223_p2), %675, %v273_v0   ;;  %v279_v5 = vunpack.c.l.s4 (!%p223_p2), %v697_v4  ;;  %v282_v8 = vshrl.u32 (!%p223_p2), %v281_v6, 7  ;;  %s700_s9 = smov (!%p223_p2), 127   ;;  %s701_s10 = smov (!%p223_p2), 15   ;;  %v458_v21 = vld [vmem:[%s843_s4] sm:$0xf] (!%p223_p2)  ;;  %v303_v22 = vand.u32 (!%p223_p2), 127, %v281_v6 }
   0x8   : > { %s702_s11 = smov (!%p223_p2), 16   ;;  %s703_s12 = smov (!%p223_p2), 112   ;;  %vm377_vm2 = vcmask (!%p223_p2), 7168   ;;  %vm347_vm3 = vcmask (!%p223_p2), 138240   ;;  %vm366_vm5 = vcmask (!%p223_p2), 121856   ;;  %vm358_vm6 = vcmask (!%p223_p2), 130048  }
   0x9   : > { %v280_v7 = vunpack.c.0.s8 (!%p223_p2), %v279_v5  ;;  %s704_s13 = smov (!%p223_p2), 111   ;;  %s705_s14 = smov (!%p223_p2), 113   ;;  %v304_v23 = vadd.s32 (!%p223_p2), 128, %v303_v22  ;;  %v309_v27 = vand.u32 (!%p223_p2), 15, %v303_v22  ;;  %vm388_vm8 = vcmask (!%p223_p2), 1039360  }
   0xa   : > { %vm410_vm9 = vcmask (!%p223_p2), 916480   ;;  %vm448_vm10 = vcmask (!%p223_p2), 1043456   ;;  %vm399_vm11 = vcmask (!%p223_p2), 924672   ;;  %vm418_vm12 = vcmask (!%p223_p2), 908288  }
   0xb   : > { %290 = vperm.xlu0 (!%p223_p2), %675, %v287_v2   ;;  %v283_v9 = vsub.s32 (!%p223_p2), %v280_v7, %v282_v8  ;;  %v316_v26 = vand.u32 (!%p223_p2), 15, %v304_v23  ;;  %vm329_vm1 = vcmp.ge.s32.totalorder (!%p223_p2), %v309_v27, 1  ;;  %vm335_vm4 = vcmp.le.s32.totalorder (!%p223_p2), %v309_v27, 14 }
   0xc   : > { %v789_v31 = vsel (!%p223_p2), %vm329_vm1, 1.0, %v696_v3  ;;  %v793_v39 = vsel (!%p223_p2), %vm335_vm4, 1.0, %v696_v3  ;;  %vm464_vm13 = vcmask (!%p223_p2), 293888  }
   0xd   : > { %s847_s22 = smov (!%p257_p3, %s625_s22), 1  ;;  %vm330_vm0 = vcmp.ge.s32.totalorder %v316_v26, 1  ;;  %vm336_vm7 = vcmp.le.s32.totalorder %v316_v26, 14 }
   0xe   : > { %s756_s27 = sshll.u32 %s847_s22, 3  ;;  %v637_v30 = vsel %vm330_vm0, 1.0, %v696_v3  ;;  %v639_v43 = vsel %vm336_vm7, 1.0, %v696_v3 }
   0xf   : > { %s261_s30 = scalar_lea.vmem %s839_s0, %s756_s27  ;;  %s266_s22 = scalar_lea.vmem %s844_s5, %s756_s27 }
  0x10   : > { %v272_v12 = vld [vmem:[%s261_s30] sm:$0xff]  ;;  %s271_s25 = scalar_lea.vmem %s845_s6, %s756_s27 }
  0x86   : > { %v277_v10 = vpop.permute.xlu0 %276 }
  0x87   : > { %v284_v11 = vrot.slane %v277_v10, %v283_v9 }
  0x89   : > { %v286_v14 = vmul.f32 %v284_v11, %v272_v12 }
  0x8a   : > { %v291_v13 = vpop.permute.xlu0 %290 }
  0x8b   : > { %v298_v15 = vrot.slane %v291_v13, %v283_v9 }
  0x8d   : > { %v300_v16 = vadd.f32 %v298_v15, %v286_v14 }
  0x8f   : > { %v762_v17 = vmax.f32 %v300_v16, 0.0 }
  0x91   : > { %343 = vrot.lane.b32.xlu0 %v762_v17, %s698_s7  ;;  %373 = vrot.lane.b32.xlu1 %v762_v17, %s699_s8  ;;  %v768_v18 = vcombine.high %v762_v17, %v762_v17 }
  0x93   : > { %v676_v19 = vpack.i.bf16 %v768_v18, %v762_v17  ;;  %v681_v20 = vpack.i.bf16 %v762_v17, %v768_v18 }
  0x95   : > { %384 = vrot.lane.b32.xlu0 %v762_v17, %s700_s9  ;;  %362 = vrot.lane.b32.xlu1 %v762_v17, %s701_s10 }
  0x99   : > { %677 = vrot.lane.b32.xlu0 %v676_v19, %s702_s11  ;;  %375 = vrot.lane.b32.xlu1 %v768_v18, %s699_s8 }
  0x9d   : > { %364 = vrot.lane.b32.xlu0 %v768_v18, %s701_s10  ;;  %345 = vrot.lane.b32.xlu1 %v768_v18, %s698_s7 }
  0xa1   : > { %682 = vrot.lane.b32.xlu0 %v681_v20, %s703_s12  ;;  %386 = vrot.lane.b32.xlu1 %v768_v18, %s700_s9 }
  0xa5   : > { %416 = vrot.lane.b32.xlu0 %v768_v18, %s704_s13  ;;  %397 = vrot.lane.b32.xlu1 %v768_v18, %s705_s14 }
  0xa9   : > { %461 = vperm.xlu0 %675, %v458_v21   ;;  %395 = vrot.lane.b32.xlu1 %v762_v17, %s705_s14 }
  0xad   : > { %414 = vrot.lane.b32.xlu1 %v762_v17, %s704_s13 }
 0x103   : > { %v344_v24 = vpop.permute.xlu0 %343  ;;  %v374_v25 = vpop.permute.xlu1 %373 }
 0x104   : > { %v381_v34 = vsel %vm377_vm2, 0.0, %v374_v25  ;;  %v351_v38 = vsel %vm347_vm3, 0.0, %v344_v24 }
 0x105   : > { %v382_v45 = vmul.f32 %v789_v31, %v381_v34  ;;  %v352_v49 = vmul.f32 %v789_v31, %v351_v38 }
 0x107   : > { %v385_v28 = vpop.permute.xlu0 %384  ;;  %v363_v29 = vpop.permute.xlu1 %362  ;;  %v432_v57 = vrot.slane %v382_v45, 4 }
 0x108   : > { %v370_v40 = vsel %vm366_vm5, 0.0, %v363_v29 }
 0x109   : > { %v371_v50 = vmul.f32 %v793_v39, %v370_v40 }
 0x10b   : > { %v678_v32 = vpop.permute.xlu0 %677  ;;  %v376_v33 = vpop.permute.xlu1 %375  ;;  %v451_v4 = vsel %vm448_vm10, %v371_v50, %v432_v57 }
 0x10c   : > { %v680_v35 = vunpack.i.h.bf16 %v678_v32  ;;  %v679_v36 = vunpack.i.l.bf16 %v678_v32  ;;  %v378_v37 = vsel %vm377_vm2, %v374_v25, %v376_v33 }
 0x10d   : > { %v383_v41 = vmul.f32 %v637_v30, %v378_v37 }
 0x10e   : > { %v361_v42 = vsel %vm358_vm6, 0.0, %v679_v36  ;;  %v359_v44 = vsel %vm358_vm6, %v679_v36, %v680_v35 }
 0x10f   : > { %v426_v46 = vrot.slane %v361_v42, 4  ;;  %v365_v47 = vpop.permute.xlu0 %364  ;;  %v346_v48 = vpop.permute.xlu1 %345  ;;  %v433_v53 = vrot.slane %v383_v41, 4  ;;  %v427_v56 = vrot.slane %v359_v44, 4 }
 0x110   : > { %v367_v51 = vsel %vm366_vm5, %v363_v29, %v365_v47  ;;  %v348_v52 = vsel %vm347_vm3, %v344_v24, %v346_v48 }
 0x111   : > { %v372_v54 = vmul.f32 %v639_v43, %v367_v51  ;;  %v353_v55 = vmul.f32 %v637_v30, %v348_v52  ;;  %v449_v62 = vsel %vm448_vm10, %v352_v49, %v426_v46 }
 0x112   : > { %v650_v7 = vpack.c.bf16 %v451_v4, %v449_v62 }
 0x113   : > { %v683_v58 = vpop.permute.xlu0 %682  ;;  %v387_v59 = vpop.permute.xlu1 %386  ;;  %v450_v60 = vsel %vm448_vm10, %v353_v55, %v427_v56  ;;  %v452_v61 = vsel %vm448_vm10, %v372_v54, %v433_v53 }
 0x114   : > { %v684_v63 = vunpack.i.l.bf16 %v683_v58  ;;  %v389_v0 = vsel %vm388_vm8, %v385_v28, %v387_v59  ;;  %v392_v1 = vsel %vm388_vm8, %v387_v59, 0.0  ;;  %v648_v3 = vpack.c.bf16 %v452_v61, %v450_v60 }
 0x115   : > { %v394_v2 = vmul.f32 %v639_v43, %v392_v1  ;;  %v685_v5 = vunpack.i.h.bf16 %v683_v58  ;;  %v393_v8 = vmul.f32 %v793_v39, %v389_v0 }
 0x116   : > { %v413_v6 = vsel %vm410_vm9, %v684_v63, 0.0  ;;  %649 = vmatprep.subr.bf16.mxu0 %v648_v3 }
 0x117   : > { %v440_v9 = vrot.slane %v394_v2, 4  ;;  %v398_v10 = vpop.permute.xlu1 %397  ;;  %651 = vmatpush1.bf16.msra.mxu0 %v650_v7  ;;  %v445_v12 = vrot.slane %v413_v6, 4  ;;  %v411_v14 = vsel %vm410_vm9, %v685_v5, %v684_v63  ;;  %v439_v15 = vrot.slane %v393_v8, 4  ;;  %v417_v16 = vpop.permute.xlu0 %416 }
 0x118   : > { %v403_v11 = vsel %vm399_vm11, %v398_v10, 0.0  ;;  %v444_v24 = vrot.slane %v411_v14, 4  ;;  %v422_v26 = vsel %vm418_vm12, %v417_v16, 0.0 }
 0x119   : > { %v405_v13 = vmul.f32 %v637_v30, %v403_v11  ;;  %v454_v20 = vsel %vm448_vm10, %v768_v18, %v440_v9  ;;  %v453_v28 = vsel %vm448_vm10, %v762_v17, %v439_v15  ;;  %v424_v18 = vmul.f32 %v639_v43, %v422_v26  ;;  %v545_v17 = vld [vmem:[%s266_s22] sm:$0xff] }
 0x11a   : > { %v547_v36 = vcombine.high %v545_v17, %v545_v17 }
 0x11b   : > { %v396_v19 = vpop.permute.xlu1 %395  ;;  %v456_v21 = vsel %vm448_vm10, %v405_v13, %v445_v12 }
 0x11c   : > { %v400_v22 = vsel %vm399_vm11, %v396_v19, %v398_v10  ;;  %v652_v23 = vpack.c.bf16 %v456_v21, %v454_v20 }
 0x11d   : > { %v404_v25 = vmul.f32 %v789_v31, %v400_v22  ;;  %v457_v31 = vld [vmem:[%s842_s3] sm:$0xf] }
 0x11e   : > { %653 = vmatprep.subr.bf16.mxu0 %v652_v23 }
 0x11f   : > { %v415_v27 = vpop.permute.xlu1 %414  ;;  %v455_v29 = vsel %vm448_vm10, %v404_v25, %v444_v24 }
 0x120   : > { %v654_v30 = vpack.c.bf16 %v455_v29, %v453_v28  ;;  %v419_v32 = vsel %vm418_vm12, %v415_v27, %v417_v16 }
 0x121   : > { %v423_v33 = vmul.f32 %v793_v39, %v419_v32 }
 0x122   : > { %655 = vmatpush1.bf16.msra.mxu0 %v654_v30 }
 0x123   : > { %640 = vmatprep.subr.msk.mxu0 %vm448_vm10, %v424_v18 }
 0x126   : > { %641 = vmatpush1.msk.msra.mxu0 %vm448_vm10, %v423_v33 }
 0x127   : > { %642 = vmatmul.mubr.msk.f32.vlgmr.msra.gmra.mrb[0].mxu0 %vm464_vm13, %v457_v31 }
 0x128   : > { %v462_v34 = vpop.permute.xlu0 %461 }
 0x1fa   : > { %v540_v35 = vpop.f32.mrb[0].mxu0 }
 0x1fb   : > { %v541_v37 = vadd.f32 %v540_v35, %v462_v34  ;;  %v542_v38 = vpop.f32.mrb[1].mxu0 }
 0x1fc   : > { %v543_v39 = vadd.f32 %v542_v38, %v462_v34 }
 0x1fd   : > { %v549_v40 = vadd.f32 %v545_v17, %v541_v37 }
 0x1fe   : > { %v550_v41 = vadd.f32 %v547_v36, %v543_v39 }
 0x1ff   : > { %v551_v42 = vmax.f32 %v549_v40, 0.0 }
 0x200   : > { %v552_v43 = vmax.f32 %v550_v41, 0.0 }
 0x202   : > { %v555_v44 = vcombine.low %v551_v42, %v552_v43 }
 0x204   : > { %557 = vst [vmem:[%s271_s25] sm:$0xff] %v555_v44 }
 0x205 PF: > { %s16_s21 = sadd.s32 1, %s693_s21  }
 0x206   : > { %p13_p4 = scmp.ge.s32.totalorder %s16_s21, 4  }
 0x208   :  { %15 = sbr.rel (!%p13_p4) target bundleno = 1 (0x1), region = 77 }

</bundles_post_ra>
